<compile_context>
chip_gen: v7x
topology: tpu7x:2x2x1
jax: 0.10.0
libtpu: 0.0.40
codegen_flags: <defaults>
</compile_context>

<pallas_src>
import math

import jax
import jax.numpy as jnp
from jax.experimental import pallas as pl
from jax.experimental.pallas import tpu as pltpu


def _round_up(x: int, m: int) -> int:
    return ((x + m - 1) // m) * m


def _timestep_embedding_kernel(t_ref, freqs_ref, w1c_ref, w1s_ref, b1_ref,
                               w2_ref, b2_ref, out_ref,
                               cos_sc, sin_sc, acc_sc):
    # t_ref:    (Bp, 1)        f32
    # freqs_ref:(1, half_p)    f32
    # w1c_ref:  (half_p, tk)   weight dtype (cos half of w1, column tile)
    # w1s_ref:  (half_p, tk)   weight dtype (sin half of w1, column tile)
    # b1_ref:   (1, tk)        f32
    # w2_ref:   (tk, Hp)       weight dtype (row tile)
    # b2_ref:   (1, Hp)        f32
    # out_ref:  (Bp, Hp)       f32
    # cos_sc / sin_sc: (Bp, half_p) f32 scratch, acc_sc: (Bp, Hp) f32 scratch
    k = pl.program_id(0)

    @pl.when(k == 0)
    def _init():
        args = t_ref[...] * freqs_ref[...]          # (Bp, half_p)
        cos_sc[...] = jnp.cos(args)
        sin_sc[...] = jnp.sin(args)
        acc_sc[...] = jnp.zeros_like(acc_sc)

    wdt = w1c_ref.dtype
    # First layer tile:  emb @ w1[:, k*tk:(k+1)*tk]  without any concatenate:
    #   cat([cos, sin]) @ w1_tile == cos @ w1c_tile + sin @ w1s_tile
    h = (jnp.dot(cos_sc[...].astype(wdt), w1c_ref[...],
                 preferred_element_type=jnp.float32)
         + jnp.dot(sin_sc[...].astype(wdt), w1s_ref[...],
                   preferred_element_type=jnp.float32)
         + b1_ref[...])
    h = h * jax.nn.sigmoid(h)                       # SiLU (f32)

    # Second layer partial product, accumulated in f32.
    acc_sc[...] += jnp.dot(h.astype(w2_ref.dtype), w2_ref[...],
                           preferred_element_type=jnp.float32)

    @pl.when(k == pl.num_programs(0) - 1)
    def _finalize():
        out_ref[...] = (acc_sc[...] + b2_ref[...]).astype(out_ref.dtype)


def timestep_embedding(timestep, freqs, w1, b1, w2, b2, *,
                       block_k: int = 512,
                       weight_dtype=jnp.bfloat16):
    """timestep: (B,) any numeric dtype. Returns (B, hidden_dim) f32.

    freqs: (H//2,), w1: (H, 4H), b1: (4H,), w2: (4H, H), b2: (H,)  (f32).
    """
    B = timestep.shape[0]
    half = freqs.shape[0]
    H_in, K = w1.shape
    K2, H = w2.shape
    assert H_in == H and K == K2 and H == 2 * half, "inconsistent parameter shapes"

    # Padded / tiled sizes.
    Bp = _round_up(B, 8)                       # sublane alignment
    Hp = _round_up(H, 128)                     # lane-dense output stores
    half_p = _round_up(half, 8)
    tk = min(block_k, _round_up(K, 128))       # intermediate-dim tile (mult of 128)
    Kp = _round_up(K, tk)
    nk = Kp // tk

    f32 = jnp.float32
    # Zero-padding is exact: padded freqs rows hit zero w1 rows, padded 4H
    # columns give silu(0)=0 against zero w2 rows, padded H columns are zero.
    t2d = jnp.zeros((Bp, 1), f32).at[:B, 0].set(timestep.astype(f32))
    freqs_p = jnp.zeros((1, half_p), f32).at[0, :half].set(freqs.astype(f32))
    w1c = jnp.zeros((half_p, Kp), weight_dtype).at[:half, :K].set(
        w1[:half, :].astype(weight_dtype))
    w1s = jnp.zeros((half_p, Kp), weight_dtype).at[:half, :K].set(
        w1[half:, :].astype(weight_dtype))
    b1p = jnp.zeros((1, Kp), f32).at[0, :K].set(b1.astype(f32))
    w2p = jnp.zeros((Kp, Hp), weight_dtype).at[:K, :H].set(w2.astype(weight_dtype))
    b2p = jnp.zeros((1, Hp), f32).at[0, :H].set(b2.astype(f32))

    wbytes = jnp.dtype(weight_dtype).itemsize
    cost = pl.CostEstimate(
        flops=2 * Bp * Kp * (2 * half_p + Hp),
        transcendentals=2 * Bp * half_p + Bp * Kp,
        bytes_accessed=(2 * half_p * Kp + Kp * Hp) * wbytes
                       + (Kp + Hp + Bp + half_p + Bp * Hp) * 4,
    )

    out_p = pl.pallas_call(
        _timestep_embedding_kernel,
        out_shape=jax.ShapeDtypeStruct((Bp, Hp), jnp.float32),
        grid_spec=pltpu.PrefetchScalarGridSpec(
            num_scalar_prefetch=0,
            grid=(nk,),
            in_specs=[
                pl.BlockSpec((Bp, 1), lambda k: (0, 0)),        # timestep
                pl.BlockSpec((1, half_p), lambda k: (0, 0)),    # freqs
                pl.BlockSpec((half_p, tk), lambda k: (0, k)),   # w1 (cos half)
                pl.BlockSpec((half_p, tk), lambda k: (0, k)),   # w1 (sin half)
                pl.BlockSpec((1, tk), lambda k: (0, k)),        # b1
                pl.BlockSpec((tk, Hp), lambda k: (k, 0)),       # w2
                pl.BlockSpec((1, Hp), lambda k: (0, 0)),        # b2
            ],
            out_specs=pl.BlockSpec((Bp, Hp), lambda k: (0, 0)),
            scratch_shapes=[
                pltpu.VMEM((Bp, half_p), jnp.float32),          # cos(args)
                pltpu.VMEM((Bp, half_p), jnp.float32),          # sin(args)
                pltpu.VMEM((Bp, Hp), jnp.float32),              # accumulator
            ],
        ),
        compiler_params=pltpu.CompilerParams(
            dimension_semantics=("arbitrary",),   # reduction over 4H tiles
            vmem_limit_bytes=48 * 1024 * 1024,    # safe on v5e/v6e/v7x
        ),
        cost_estimate=cost,
    )(t2d, freqs_p, w1c, w1s, b1p, w2p, b2p)

    return out_p[:B, :H]


def make_params(hidden_dim, key):
    """Deterministic synthetic parameters matching the PyTorch module shapes."""
    half_dim = hidden_dim // 2
    freqs = jnp.exp(
        -math.log(10000.0) * jnp.arange(half_dim, dtype=jnp.float32) / half_dim)
    k1, k2, k3, k4 = jax.random.split(key, 4)
    # nn.Linear(hidden, hidden*4): weight (4H, H) -> stored transposed (H, 4H)
    w1 = jax.random.normal(k1, (hidden_dim, hidden_dim * 4), jnp.float32) * 0.02
    b1 = jax.random.normal(k2, (hidden_dim * 4,), jnp.float32) * 0.02
    # nn.Linear(hidden*4, hidden): weight (H, 4H) -> stored transposed (4H, H)
    w2 = jax.random.normal(k3, (hidden_dim * 4, hidden_dim), jnp.float32) * 0.02
    b2 = jax.random.normal(k4, (hidden_dim,), jnp.float32) * 0.02
    return freqs, w1, b1, w2, b2


def reference(timestep, freqs, w1, b1, w2, b2):
    args = timestep.astype(jnp.float32)[:, None] * freqs[None, :]
    emb = jnp.concatenate([jnp.cos(args), jnp.sin(args)], axis=-1)
    h = emb @ w1 + b1
    h = h * jax.nn.sigmoid(h)
    return h @ w2 + b2


if __name__ == "__main__":
    hidden_dim = 32
    batch = 8
    key = jax.random.PRNGKey(0)
    kp, kt = jax.random.split(key)
    freqs, w1, b1, w2, b2 = make_params(hidden_dim, kp)
    timestep = jax.random.randint(kt, (batch,), 0, 1000).astype(jnp.int32)

    ref = reference(timestep, freqs, w1, b1, w2, b2)

    # Tight correctness check with f32 weight streaming (same math as reference).
    out_f32 = timestep_embedding(timestep, freqs, w1, b1, w2, b2,
                                 weight_dtype=jnp.float32)
    out_f32 = jax.block_until_ready(out_f32)
    assert out_f32.shape == (batch, hidden_dim)
    assert jnp.allclose(out_f32, ref, atol=2e-4, rtol=2e-4), "f32 mismatch vs reference"

    # Performance configuration: bf16 weight streaming (kernel is HBM-bound on
    # weights), f32 accumulation; looser tolerance accounts for bf16 operands.
    out_bf16 = timestep_embedding(timestep, freqs, w1, b1, w2, b2)
    out_bf16 = jax.block_until_ready(out_bf16)
    assert out_bf16.shape == (batch, hidden_dim)
    assert jnp.allclose(out_bf16, ref, atol=1e-2, rtol=1e-2), "bf16 mismatch vs reference"

    print("KERNEL_OK")
</pallas_src>

<mosaic_0001>
module attributes {stable_mosaic.version = 11 : i64} {
  func.func @_timestep_embedding_kernel(%arg0: i32, %arg1: memref<8x1xf32, #tpu.memory_space<vmem>>, %arg2: memref<1x16xf32, #tpu.memory_space<vmem>>, %arg3: memref<16x128xf32, #tpu.memory_space<vmem>>, %arg4: memref<16x128xf32, #tpu.memory_space<vmem>>, %arg5: memref<1x128xf32, #tpu.memory_space<vmem>>, %arg6: memref<128x128xf32, #tpu.memory_space<vmem>>, %arg7: memref<1x128xf32, #tpu.memory_space<vmem>>, %arg8: memref<8x128xf32, #tpu.memory_space<vmem>>, %arg9: memref<8x16xf32, #tpu.memory_space<vmem>>, %arg10: memref<8x16xf32, #tpu.memory_space<vmem>>, %arg11: memref<8x128xf32, #tpu.memory_space<vmem>>) attributes {dimension_semantics = [#tpu.dimension_semantics<arbitrary>], iteration_bounds = array<i64: 1>, scalar_prefetch = 0 : i64, scratch_operands = 3 : i64, tpu.core_type = #tpu.core_type<tc>, window_params = [{pipeline_mode = #tpu.pipeline_mode<synchronous>, transform_indices = @transform_0, window_bounds = array<i64: 8, 1>}, {pipeline_mode = #tpu.pipeline_mode<synchronous>, transform_indices = @transform_1, window_bounds = array<i64: 1, 16>}, {transform_indices = @transform_2, window_bounds = array<i64: 16, 128>}, {transform_indices = @transform_3, window_bounds = array<i64: 16, 128>}, {transform_indices = @transform_4, window_bounds = array<i64: 1, 128>}, {transform_indices = @transform_5, window_bounds = array<i64: 128, 128>}, {pipeline_mode = #tpu.pipeline_mode<synchronous>, transform_indices = @transform_6, window_bounds = array<i64: 1, 128>}, {pipeline_mode = #tpu.pipeline_mode<synchronous>, transform_indices = @transform_7, window_bounds = array<i64: 8, 128>}]} {
    %c0_i32 = arith.constant 0 : i32
    %0 = arith.cmpi eq, %arg0, %c0_i32 : i32
    %1 = arith.extui %0 : i1 to i32
    %c0_i32_0 = arith.constant 0 : i32
    %2 = arith.cmpi ne, %1, %c0_i32_0 : i32
    scf.if %2 {
      %c0_21 = arith.constant 0 : index
      %c0_22 = arith.constant 0 : index
      %27 = vector.load %arg1[%c0_21, %c0_22] : memref<8x1xf32, #tpu.memory_space<vmem>>, vector<8x1xf32>
      %c0_23 = arith.constant 0 : index
      %c0_24 = arith.constant 0 : index
      %28 = vector.load %arg2[%c0_23, %c0_24] : memref<1x16xf32, #tpu.memory_space<vmem>>, vector<1x16xf32>
      %29 = vector.broadcast %27 : vector<8x1xf32> to vector<8x16xf32>
      %30 = vector.broadcast %28 : vector<1x16xf32> to vector<8x16xf32>
      %31 = arith.mulf %29, %30 : vector<8x16xf32>
      %32 = math.cos %31 : vector<8x16xf32>
      %c0_25 = arith.constant 0 : index
      %c0_26 = arith.constant 0 : index
      %33 = vector.load %arg9[%c0_25, %c0_26] : memref<8x16xf32, #tpu.memory_space<vmem>>, vector<8x16xf32>
      tpu.vector_store %arg9[%c0_25, %c0_26], %32 {strides = array<i32>} : memref<8x16xf32, #tpu.memory_space<vmem>>, vector<8x16xf32>,
      %34 = math.sin %31 : vector<8x16xf32>
      %c0_27 = arith.constant 0 : index
      %c0_28 = arith.constant 0 : index
      %35 = vector.load %arg10[%c0_27, %c0_28] : memref<8x16xf32, #tpu.memory_space<vmem>>, vector<8x16xf32>
      tpu.vector_store %arg10[%c0_27, %c0_28], %34 {strides = array<i32>} : memref<8x16xf32, #tpu.memory_space<vmem>>, vector<8x16xf32>,
      %cst_29 = arith.constant 0.000000e+00 : f32
      %36 = vector.broadcast %cst_29 : f32 to vector<8x128xf32>
      %c0_30 = arith.constant 0 : index
      %c0_31 = arith.constant 0 : index
      %37 = vector.load %arg11[%c0_30, %c0_31] : memref<8x128xf32, #tpu.memory_space<vmem>>, vector<8x128xf32>
      tpu.vector_store %arg11[%c0_30, %c0_31], %36 {strides = array<i32>} : memref<8x128xf32, #tpu.memory_space<vmem>>, vector<8x128xf32>,
    } else {
    }
    %c0 = arith.constant 0 : index
    %c0_1 = arith.constant 0 : index
    %3 = vector.load %arg9[%c0, %c0_1] : memref<8x16xf32, #tpu.memory_space<vmem>>, vector<8x16xf32>
    %c0_2 = arith.constant 0 : index
    %c0_3 = arith.constant 0 : index
    %4 = vector.load %arg3[%c0_2, %c0_3] : memref<16x128xf32, #tpu.memory_space<vmem>>, vector<16x128xf32>
    %cst = arith.constant dense<0.000000e+00> : vector<8x128xf32>
    %5 = tpu.matmul %3, %4, %cst {dimension_numbers = #tpu.dot_dimension_numbers<[1], [0], [0], [1], [0, 0, 1, 1], [], []>} : vector<8x16xf32>, vector<16x128xf32>, vector<8x128xf32> -> vector<8x128xf32>
    %c0_4 = arith.constant 0 : index
    %c0_5 = arith.constant 0 : index
    %6 = vector.load %arg10[%c0_4, %c0_5] : memref<8x16xf32, #tpu.memory_space<vmem>>, vector<8x16xf32>
    %c0_6 = arith.constant 0 : index
    %c0_7 = arith.constant 0 : index
    %7 = vector.load %arg4[%c0_6, %c0_7] : memref<16x128xf32, #tpu.memory_space<vmem>>, vector<16x128xf32>
    %cst_8 = arith.constant dense<0.000000e+00> : vector<8x128xf32>
    %8 = tpu.matmul %6, %7, %cst_8 {dimension_numbers = #tpu.dot_dimension_numbers<[1], [0], [0], [1], [0, 0, 1, 1], [], []>} : vector<8x16xf32>, vector<16x128xf32>, vector<8x128xf32> -> vector<8x128xf32>
    %9 = arith.addf %5, %8 : vector<8x128xf32>
    %c0_9 = arith.constant 0 : index
    %c0_10 = arith.constant 0 : index
    %10 = vector.load %arg5[%c0_9, %c0_10] : memref<1x128xf32, #tpu.memory_space<vmem>>, vector<1x128xf32>
    %11 = vector.broadcast %10 : vector<1x128xf32> to vector<8x128xf32>
    %12 = arith.addf %9, %11 : vector<8x128xf32>
    %13 = arith.negf %12 : vector<8x128xf32>
    %14 = math.exp %13 : vector<8x128xf32>
    %cst_11 = arith.constant 1.000000e+00 : f32
    %15 = vector.broadcast %cst_11 : f32 to vector<8x128xf32>
    %16 = arith.addf %15, %14 : vector<8x128xf32>
    %17 = arith.divf %15, %16 : vector<8x128xf32>
    %18 = arith.mulf %12, %17 : vector<8x128xf32>
    %c0_12 = arith.constant 0 : index
    %c0_13 = arith.constant 0 : index
    %19 = vector.load %arg11[%c0_12, %c0_13] : memref<8x128xf32, #tpu.memory_space<vmem>>, vector<8x128xf32>
    %c0_14 = arith.constant 0 : index
    %c0_15 = arith.constant 0 : index
    %20 = vector.load %arg6[%c0_14, %c0_15] : memref<128x128xf32, #tpu.memory_space<vmem>>, vector<128x128xf32>
    %cst_16 = arith.constant dense<0.000000e+00> : vector<8x128xf32>
    %21 = tpu.matmul %18, %20, %cst_16 {dimension_numbers = #tpu.dot_dimension_numbers<[1], [0], [0], [1], [0, 0, 1, 1], [], []>} : vector<8x128xf32>, vector<128x128xf32>, vector<8x128xf32> -> vector<8x128xf32>
    %22 = arith.addf %19, %21 : vector<8x128xf32>
    %c0_17 = arith.constant 0 : index
    %c0_18 = arith.constant 0 : index
    %23 = vector.load %arg11[%c0_17, %c0_18] : memref<8x128xf32, #tpu.memory_space<vmem>>, vector<8x128xf32>
    tpu.vector_store %arg11[%c0_17, %c0_18], %22 {strides = array<i32>} : memref<8x128xf32, #tpu.memory_space<vmem>>, vector<8x128xf32>,
    %c0_i32_19 = arith.constant 0 : i32
    %24 = arith.cmpi eq, %arg0, %c0_i32_19 : i32
    %25 = arith.extui %24 : i1 to i32
    %c0_i32_20 = arith.constant 0 : i32
    %26 = arith.cmpi ne, %25, %c0_i32_20 : i32
    scf.if %26 {
      %c0_21 = arith.constant 0 : index
      %c0_22 = arith.constant 0 : index
      %27 = vector.load %arg11[%c0_21, %c0_22] : memref<8x128xf32, #tpu.memory_space<vmem>>, vector<8x128xf32>
      %c0_23 = arith.constant 0 : index
      %c0_24 = arith.constant 0 : index
      %28 = vector.load %arg7[%c0_23, %c0_24] : memref<1x128xf32, #tpu.memory_space<vmem>>, vector<1x128xf32>
      %29 = vector.broadcast %28 : vector<1x128xf32> to vector<8x128xf32>
      %30 = arith.addf %27, %29 : vector<8x128xf32>
      %c0_25 = arith.constant 0 : index
      %c0_26 = arith.constant 0 : index
      %31 = vector.load %arg8[%c0_25, %c0_26] : memref<8x128xf32, #tpu.memory_space<vmem>>, vector<8x128xf32>
      tpu.vector_store %arg8[%c0_25, %c0_26], %30 {strides = array<i32>} : memref<8x128xf32, #tpu.memory_space<vmem>>, vector<8x128xf32>,
    } else {
    }
    return
  }
  func.func @transform_0(%arg0: i32) -> (i32, i32) {
    %c0_i32 = arith.constant 0 : i32
    %c0_i32_0 = arith.constant 0 : i32
    %c0_i32_1 = arith.constant 0 : i32
    return %c0_i32, %c0_i32_0 : i32, i32
  }
  func.func @transform_1(%arg0: i32) -> (i32, i32) {
    %c0_i32 = arith.constant 0 : i32
    %c0_i32_0 = arith.constant 0 : i32
    %c0_i32_1 = arith.constant 0 : i32
    return %c0_i32, %c0_i32_0 : i32, i32
  }
  func.func @transform_2(%arg0: i32) -> (i32, i32) {
    %c0_i32 = arith.constant 0 : i32
    %c0_i32_0 = arith.constant 0 : i32
    return %c0_i32, %arg0 : i32, i32
  }
  func.func @transform_3(%arg0: i32) -> (i32, i32) {
    %c0_i32 = arith.constant 0 : i32
    %c0_i32_0 = arith.constant 0 : i32
    return %c0_i32, %arg0 : i32, i32
  }
  func.func @transform_4(%arg0: i32) -> (i32, i32) {
    %c0_i32 = arith.constant 0 : i32
    %c0_i32_0 = arith.constant 0 : i32
    return %c0_i32, %arg0 : i32, i32
  }
  func.func @transform_5(%arg0: i32) -> (i32, i32) {
    %c0_i32 = arith.constant 0 : i32
    %c0_i32_0 = arith.constant 0 : i32
    return %arg0, %c0_i32 : i32, i32
  }
  func.func @transform_6(%arg0: i32) -> (i32, i32) {
    %c0_i32 = arith.constant 0 : i32
    %c0_i32_0 = arith.constant 0 : i32
    %c0_i32_1 = arith.constant 0 : i32
    return %c0_i32, %c0_i32_0 : i32, i32
  }
  func.func @transform_7(%arg0: i32) -> (i32, i32) {
    %c0_i32 = arith.constant 0 : i32
    %c0_i32_0 = arith.constant 0 : i32
    %c0_i32_1 = arith.constant 0 : i32
    return %c0_i32, %c0_i32_0 : i32, i32
  }
}

</mosaic_0001>

<bundles_post_ra>
// kernel: tpu_custom_call.1
= control target key start
LH: loop header
LB: loop body
LE: loop exit
PB: predicated region body
PF: predicated region fallthrough
CT: control target
= control target key end

     0   :  { %12 = vsyncpa [#allocation6], 0  ;;  %s986_s0 = inlined_call_operand.vmem [shape: f32[8,1], index: 0, kind: input, shape index: {}]   ;;  %s987_s1 = inlined_call_operand.hbm [shape: f32[1,16], index: 1, kind: input, shape index: {}]   ;;  %s988_s2 = inlined_call_operand.vmem [shape: f32[16,128], index: 2, kind: input, shape index: {}]   ;;  %s989_s3 = inlined_call_operand.hbm [shape: f32[16,128], index: 3, kind: input, shape index: {}]   ;;  %s990_s4 = inlined_call_operand.vmem [shape: f32[1,128], index: 4, kind: input, shape index: {}]   ;;  %s991_s5 = inlined_call_operand.hbm [shape: f32[128,128], index: 5, kind: input, shape index: {}]   ;;  %s992_s6 = inlined_call_operand.vmem [shape: f32[1,128], index: 6, kind: input, shape index: {}]   ;;  %s993_s7 = inlined_call_operand.hbm [shape: f32[8,128], index: 7, kind: output, shape index: {}]  }
   0x1   :  { %13 = vsyncpa [#allocation9], 0 }
   0x2   :  { %14 = vsyncpa [#allocation7], 0  ;;  %s820_s24 = smov [#allocation8]   ;;  %s726_s28 = scalar_lea.hbm %s989_s3, 256 }
   0x3   :  { %s34_s25 = sshll.u32 %s820_s24, 4  ;;  %p727_p0 = scmp.ne.s32.totalorder %s989_s3, %s726_s28  ;;  %s35_s25 = int_to_ptr.vmem [resolvable:$true] %s34_s25 }
   0x4   :  { %p730_p1 = scmp.lt.u32.totalorder %s726_s28, %s989_s3 }
   0x6   :  { %p732_p2 = pnand %p730_p1, %p727_p0 }
   0x8   :  { %735 = shalt.err (!%p732_p2)
}
   0x9   :  { %s736_s10 = scalar_lea.vmem %s35_s25, 256  ;;  %p741_p4 = scmp.lt.s32.totalorder %s35_s25, %s35_s25 }
   0xa   :  { %p737_p3 = scmp.ne.s32.totalorder %s35_s25, %s736_s10  ;;  %p742_p5 = scmp.lt.s32.totalorder %s736_s10, %s736_s10 }
   0xc   :  { %p743_p6 = por %p742_p5, %p741_p4 }
   0xe   :  { %p744_p7 = pnand %p743_p6, %p737_p3 }
  0x10   :  { %747 = shalt.err (!%p744_p7)
}
  0x11   :  { %s821_s11 = smov 128   ;;  %s822_s12 = smov 8  }
  0x12   :  { %40 = dma.hbm_to_vmem [thread:$0]  %s989_s3, 256, %s35_s25, [#allocation9], %s821_s11, %s821_s11, %s822_s12  }
  0x13   :  { %s823_s15 = smov [#allocation5]   ;;  %s824_s17 = smov [#allocation10]  }
  0x14   :  { %s23_s16 = sshll.u32 %s823_s15, 4  ;;  %s48_s18 = sshll.u32 %s824_s17, 4  ;;  %s24_s16 = int_to_ptr.vmem [resolvable:$true] %s23_s16  ;;  %s49_s18 = int_to_ptr.vmem [resolvable:$true] %s48_s18 }
  0x15   :  { %s748_s21 = scalar_lea.hbm %s987_s1, 16 }
  0x16   :  { %p749_p8 = scmp.ne.s32.totalorder %s987_s1, %s748_s21  ;;  %p752_p9 = scmp.lt.u32.totalorder %s748_s21, %s987_s1 }
  0x18   :  { %p754_p10 = pnand %p752_p9, %p749_p8 }
  0x1a   :  { %757 = shalt.err (!%p754_p10)
}
  0x1b   :  { %s758_s3 = scalar_lea.vmem %s24_s16, 16  ;;  %s762_s25 = scalar_lea.vmem %s24_s16, 32 }
  0x1c   :  { %p759_p11 = scmp.ne.s32.totalorder %s24_s16, %s758_s3  ;;  %p763_p12 = scmp.lt.s32.totalorder %s24_s16, %s24_s16 }
  0x1d   :  { %p764_p13 = scmp.lt.s32.totalorder %s762_s25, %s758_s3 }
  0x1f   :  { %p765_p0 = por %p764_p13, %p763_p12 }
  0x21   :  { %p766_p1 = pnand %p765_p0, %p759_p11 }
  0x23   :  { %769 = shalt.err (!%p766_p1)
}
  0x24   :  { %26 = dma.hbm_to_vmem [thread:$0]  %s987_s1, 16, %s24_s16, [#allocation6]  }
  0x25   :  { %s770_s8 = scalar_lea.hbm %s991_s5, 2048 }
  0x26   :  { %p771_p2 = scmp.ne.s32.totalorder %s991_s5, %s770_s8  ;;  %p774_p3 = scmp.lt.u32.totalorder %s770_s8, %s991_s5 }
  0x28   :  { %p776_p4 = pnand %p774_p3, %p771_p2 }
  0x2a   :  { %779 = shalt.err (!%p776_p4)
}
  0x2b   :  { %s780_s15 = scalar_lea.vmem %s49_s18, 2048  ;;  %p785_p6 = scmp.lt.s32.totalorder %s49_s18, %s49_s18 }
  0x2c   :  { %p781_p5 = scmp.ne.s32.totalorder %s49_s18, %s780_s15  ;;  %p786_p7 = scmp.lt.s32.totalorder %s780_s15, %s780_s15 }
  0x2e   :  { %p787_p8 = por %p786_p7, %p785_p6 }
  0x30   :  { %p788_p9 = pnand %p787_p8, %p781_p5 }
  0x32   :  { %791 = shalt.err (!%p788_p9)
}
  0x33   :  { %54 = dma.hbm_to_vmem [thread:$0]  %s991_s5, 2048, %s49_s18, [#allocation9], %s821_s11, %s821_s11, %s822_s12  }
  0x34   :  { %814 = dma.done.wait [#allocation6], 16  }
  0x35   :  { %815 = vsyncadd [#allocation6], 4294967280 }
  0x36   :  { %816 = dma.done.wait [#allocation9], 2304  }
  0x37   :  { %817 = vsyncadd [#allocation9], 4294964992  ;;  %v825_v0 = vmov 0   ;;  %v70_v1 = vld [vmem:[%s986_s0] sm:$0xff]  ;;  %v299_v2 = vld [vmem:[#allocation8] sm:$0xff]  ;;  %v826_v4 = vmov 0.0|0.0  }
  0x38   :  { %717 = vset.pattern.permute.xlu0 %v825_v0  ;;  %v300_v3 = vld [vmem:[#allocation8 + $0x8] sm:$0xff]  ;;  %667 = vmatprep.subr.bf16.mxu1 %v826_v4  ;;  %vm827_vm0 = vmmov 0   ;;  %v828_v6 = vmov 0.0   ;;  %v581_v7 = vld [vmem:[#allocation5] ss:$0 sm:$0xff]  ;;  %vm187_vm11 = vcmask 130048  }
  0x39   :  { %74 = vperm.xlu0 %717, %v70_v1   ;;  %v668_v5 = vpack.c.bf16 %v300_v3, %v299_v2  ;;  %622 = vmatprep.mubr.msk.f32.mxu1 %vm827_vm0, %v828_v6  ;;  %v829_v20 = vmov 683565275   ;;  %v830_v22 = vmov 2475754826   ;;  %v831_v25 = vmov 2131351028  }
  0x3a   :  { %673 = vmatprep.subr.bf16.mxu0 %v826_v4  ;;  %664 = vmatprep.mubr.msk.f32.mxu0 %vm827_vm0, %v828_v6  ;;  %v832_v28 = vmov 2102212464   ;;  %v833_v31 = vmov 920167782   ;;  %v834_v34 = vmov 1326507024  }
  0x3b   :  { %669 = vmatpush3.bf16.msra.mxu1 %v668_v5  ;;  %s835_s22 = smov [#allocation11]  }
  0x3c   :  { %670 = vmatprep.subr.bf16.mxu1 %v826_v4  ;;  %s571_s23 = sshll.u32 %s835_s22, 4  ;;  %s572_s23 = int_to_ptr.vmem [resolvable:$true] %s571_s23 }
  0x3d   :  { %p797_p11 = scmp.lt.s32.totalorder %s572_s23, %s572_s23 }
  0xb8   :  { %v75_v8 = vpop.permute.xlu0 %74 }
  0xb9   :  { %v928_v9 = vmul.f32 %v581_v7, %v75_v8 }
  0xbb   :  { %v87_v10 = vand.u32 2139095040, %v928_v9  ;;  %v84_v14 = vand.u32 2147483647, %v928_v9  ;;  %vm86_vm8 = vcmp.lt.s32.totalorder %v928_v9, 0 }
  0xbd   :  { %v88_v11 = vshrl.u32 %v87_v10, 23  ;;  %v91_v17 = vand.u32 8388607, %v84_v14  ;;  %vm85_vm9 = vcmp.le.f32.partialorder %v84_v14, 0.7853982 }
  0xbf   :  { %v582_v12 = vadd.s32 4294967169, %v88_v11  ;;  %v92_v36 = vor.u32 8388608, %v91_v17 }
  0xc1   :  { %v94_v13 = vadd.s32 1, %v582_v12  ;;  %v132_v50 = vshll.u32 %v92_v36, 8 }
  0xc3   :  { %vm95_vm1 = vcmp.gt.s32.totalorder %v94_v13, 0 }
  0xc4   :  { %v96_v15 = vsel %vm95_vm1, %v94_v13, 0 }
  0xc5   :  { %v98_v16 = vand.u32 31, %v96_v15  ;;  %v97_v19 = vshrl.u32 %v96_v15, 5 }
  0xc7   :  { %v99_v18 = vsub.s32 32, %v98_v16  ;;  %v101_v21 = vshll.u32 %v829_v20, %v98_v16  ;;  %v104_v23 = vshll.u32 %v830_v22, %v98_v16  ;;  %v107_v27 = vshll.u32 %v831_v25, %v98_v16 }
  0xc8   :  { %v110_v30 = vshll.u32 %v832_v28, %v98_v16  ;;  %v113_v33 = vshll.u32 %v833_v31, %v98_v16  ;;  %vm116_vm2 = vcmp.lt.s32.totalorder %v97_v19, 1  ;;  %vm119_vm3 = vcmp.lt.s32.totalorder %v97_v19, 4 }
  0xc9   :  { %v102_v24 = vshrl.u32 %v830_v22, %v99_v18  ;;  %v105_v26 = vshrl.u32 %v831_v25, %v99_v18  ;;  %v108_v29 = vshrl.u32 %v832_v28, %v99_v18  ;;  %v111_v32 = vshrl.u32 %v833_v31, %v99_v18 }
  0xca   :  { %v114_v35 = vshrl.u32 %v834_v34, %v99_v18  ;;  %v100_v45 = vshrl.u32 %v829_v20, %v99_v18  ;;  %vm118_vm4 = vcmp.lt.s32.totalorder %v97_v19, 3  ;;  %vm117_vm5 = vcmp.lt.s32.totalorder %v97_v19, 2 }
  0xcb   :  { %v103_v37 = vor.u32 %v102_v24, %v101_v21  ;;  %v106_v38 = vor.u32 %v105_v26, %v104_v23  ;;  %v109_v39 = vor.u32 %v108_v29, %v107_v27  ;;  %v112_v40 = vor.u32 %v111_v32, %v110_v30 }
  0xcc   :  { %v115_v41 = vor.u32 %v114_v35, %v113_v33 }
  0xcd   :  { %v121_v42 = vsel %vm119_vm3, %v109_v39, 2102212464  ;;  %v124_v43 = vsel %vm116_vm2, %v103_v37, %v106_v38  ;;  %v128_v44 = vsel %vm116_vm2, %v106_v38, %v109_v39  ;;  %v125_v46 = vsel %vm119_vm3, %v112_v40, 920167782 }
  0xce   :  { %v129_v47 = vsel %vm119_vm3, %v115_v41, 1326507024  ;;  %v126_v48 = vsel %vm118_vm4, %v109_v39, %v125_v46  ;;  %v120_v51 = vsel %vm116_vm2, %v100_v45, %v103_v37  ;;  %v122_v52 = vsel %vm118_vm4, %v106_v38, %v121_v42  ;;  %v296_v45 = vld [vmem:[%s988_s2] sm:$0xff]  ;;  %v297_v46 = vld [vmem:[%s988_s2 + $0x8] sm:$0xff] }
  0xcf   :  { %v130_v49 = vsel %vm118_vm4, %v112_v40, %v129_v47  ;;  %v127_v53 = vsel %vm117_vm5, %v124_v43, %v126_v48  ;;  %v123_v59 = vsel %vm117_vm5, %v120_v51, %v122_v52  ;;  %vm176_vm2 = vweird.f32 %v928_v9  ;;  %v466_v52 = vld [vmem:[#allocation10 + $0x10] sm:$0xff] }
  0xd0   :  { %v131_v54 = vsel %vm117_vm5, %v128_v44, %v130_v49  ;;  %v937_v57 = vmul.u32.u64.low %v132_v50, %v127_v53  ;;  %v938_v58 = vmul.u32.u64.high %v132_v50, %v127_v53, %v937_v57  ;;  %v139_v61 = vmul.u32 %v132_v50, %v123_v59  ;;  %v464_v49 = vld [vmem:[#allocation10] sm:$0xff]  ;;  %v467_v53 = vld [vmem:[#allocation10 + $0x18] sm:$0xff] }
  0xd1   :  { %v934_v55 = vmul.u32.u64.low %v132_v50, %v131_v54  ;;  %v935_v56 = vmul.u32.u64.high %v132_v50, %v131_v54, %v934_v55  ;;  %v671_v47 = vpack.c.bf16 %v297_v46, %v296_v45  ;;  %v465_v50 = vld [vmem:[#allocation10 + $0x8] sm:$0xff]  ;;  %v677_v54 = vpack.c.bf16 %v467_v53, %v466_v52 }
  0xd2   :  { %v142_v60 = vadd.s32 1, %v938_v58  ;;  %v674_v51 = vpack.c.bf16 %v465_v50, %v464_v49  ;;  %v468_v55 = vld [vmem:[#allocation10 + $0x20] sm:$0xff] }
  0xd3   :  { %vm141_vm6 = vc.u32 %v935_v56, %v937_v57  ;;  %v140_v12 = vadd.s32 %v937_v57, %v935_v56  ;;  %v469_v56 = vld [vmem:[#allocation10 + $0x28] sm:$0xff] }
  0xd4   :  { %v143_v62 = vsel %vm141_vm6, %v142_v60, %v938_v58  ;;  %675 = vmatpush3.bf16.msra.mxu0 %v674_v51  ;;  %v680_v57 = vpack.c.bf16 %v469_v56, %v468_v55  ;;  %v471_v58 = vld [vmem:[#allocation10 + $0x38] sm:$0xff]  ;;  %v472_v60 = vld [vmem:[#allocation10 + $0x40] sm:$0xff] }
  0xd5   :  { %v144_v63 = vadd.s32 %v143_v62, %v139_v61  ;;  %676 = vmatprep.subr.bf16.mxu0 %v826_v4  ;;  %v473_v61 = vld [vmem:[#allocation10 + $0x48] sm:$0xff] }
  0xd6   :  { %v686_v62 = vpack.c.bf16 %v473_v61, %v472_v60 }
  0xd7   :  { %v145_v0 = vadd.s32 536870912, %v144_v63 }
  0xd8   :  { %678 = vmatpush3.bf16.msra.mxu0 %v677_v54 }
  0xd9   :  { %v146_v1 = vshrl.u32 %v145_v0, 30  ;;  %679 = vmatprep.subr.bf16.mxu0 %v826_v4  ;;  %v475_v0 = vld [vmem:[#allocation10 + $0x58] sm:$0xff] }
  0xdb   :  { %v147_v2 = vshll.u32 %v146_v1, 30  ;;  %v170_v25 = vsub.s32 4, %v146_v1 }
  0xdc   :  { %681 = vmatpush3.bf16.msra.mxu0 %v680_v57 }
  0xdd   :  { %v148_v3 = vsub.s32 %v144_v63, %v147_v2  ;;  %v171_v28 = vsel %vm86_vm8, %v170_v25, %v146_v1  ;;  %682 = vmatprep.subr.bf16.mxu0 %v826_v4  ;;  %v474_v63 = vld [vmem:[#allocation10 + $0x50] sm:$0xff]  ;;  %v476_v1 = vld [vmem:[#allocation10 + $0x60] sm:$0xff] }
  0xde   :  { %v173_v30 = vsel %vm85_vm9, 0, %v171_v28  ;;  %v689_v2 = vpack.c.bf16 %v475_v0, %v474_v63 }
  0xdf   :  { %v150_v5 = vsub.s32 0, %v148_v3  ;;  %v282_v31 = vadd.s32 3, %v173_v30  ;;  %v177_v32 = vand.u32 3, %v173_v30 }
  0xe1   :  { %v583_v7 = vmin.u32 %v150_v5, %v148_v3  ;;  %v283_v33 = vand.u32 3, %v282_v31  ;;  %vm182_vm10 = vcmp.eq.s32.totalorder %v177_v32, 2  ;;  %vm179_vm13 = vcmp.eq.s32.totalorder %v177_v32, 0 }
  0xe2   :  { %vm178_vm15 = vcmp.lt.s32.totalorder %v177_v32, 2 }
  0xe3   :  { %v152_v8 = vclz %v583_v7  ;;  %vm288_vm12 = vcmp.eq.s32.totalorder %v283_v33, 2  ;;  %vm285_vm14 = vcmp.eq.s32.totalorder %v283_v33, 0  ;;  %vm284_vm1 = vcmp.lt.s32.totalorder %v283_v33, 2  ;;  %v478_v7 = vld [vmem:[#allocation10 + $0x70] sm:$0xff] }
  0xe5   :  { %v584_v10 = vadd.s32 4294967294, %v152_v8  ;;  %v479_v8 = vld [vmem:[#allocation10 + $0x78] sm:$0xff] }
  0xe7   :  { %vm585_vm7 = vcmp.lt.s32.totalorder %v584_v10, 0 }
  0xe8   :  { %v155_v11 = vsel %vm585_vm7, 0, %v584_v10  ;;  %v695_v10 = vpack.c.bf16 %v479_v8, %v478_v7 }
  0xe9   :  { %v156_v13 = vsub.s32 32, %v155_v11  ;;  %v160_v15 = vsub.s32 4294967266, %v155_v11  ;;  %v157_v16 = vshll.u32 %v148_v3, %v155_v11  ;;  %v477_v3 = vld [vmem:[#allocation10 + $0x68] sm:$0xff] }
  0xea   :  { %v692_v5 = vpack.c.bf16 %v477_v3, %v476_v1 }
  0xeb   :  { %v158_v17 = vshrl.u32 %v140_v12, %v156_v13  ;;  %v161_v18 = vadd.s32 127, %v160_v15  ;;  %v592_v15 = vld [vmem:[%s990_s4] ss:$0 sm:$0xff]  ;;  %s792_s4 = scalar_lea.vmem %s572_s23, 128 }
  0xec   :  { %p793_p10 = scmp.ne.s32.totalorder %s572_s23, %s792_s4  ;;  %p798_p12 = scmp.lt.s32.totalorder %s792_s4, %s792_s4 }
  0xed   :  { %v159_v19 = vor.u32 %v158_v17, %v157_v16  ;;  %v162_v20 = vshll.u32 %v161_v18, 23 }
  0xee   :  { %p799_p13 = por %p798_p12, %p797_p11 }
  0xef   :  { %v163_v21 = vor.u32 4788187, %v162_v20  ;;  %v166_v23 = vcvt.s32.f32 %v159_v19 }
  0xf0   :  { %p800_p0 = pnand %p799_p13, %p793_p10 }
  0xf1   :  { %v164_v22 = vand.u32 2147483647, %v163_v21 }
  0xf3   :  { %v167_v24 = vmul.f32 %v166_v23, %v164_v22 }
  0xf5   :  { %v168_v26 = vxor.u32 2147483648, %v167_v24 }
  0xf7   :  { %v169_v27 = vsel %vm86_vm8, %v168_v26, %v167_v24 }
  0xf8   :  { %v172_v29 = vsel %vm85_vm9, %v928_v9, %v169_v27 }
  0xf9   :  { %718 = vcosq.f32 %v172_v29 }
  0xfa   :  { %720 = vsinq.f32 %v172_v29 }
 0x103   :  { %v719_v34 = vpop.eup %718 }
 0x104   :  { %v721_v35 = vpop.eup %720  ;;  %v183_v36 = vxor.u32 2147483648, %v719_v34 }
 0x105   :  { %v180_v37 = vxor.u32 2147483648, %v721_v35 }
 0x106   :  { %v184_v38 = vsel %vm182_vm10, %v183_v36, %v721_v35  ;;  %v290_v14 = vsel %vm288_vm12, %v183_v36, %v721_v35 }
 0x107   :  { %v181_v39 = vsel %vm179_vm13, %v719_v34, %v180_v37  ;;  %v287_v40 = vsel %vm285_vm14, %v719_v34, %v180_v37 }
 0x108   :  { %v185_v41 = vsel %vm178_vm15, %v181_v39, %v184_v38  ;;  %v291_v42 = vsel %vm284_vm1, %v287_v40, %v290_v14 }
 0x109   :  { %v186_v43 = vsel %vm176_vm2, nan, %v185_v41  ;;  %v292_v44 = vsel %vm176_vm2, nan, %v291_v42 }
 0x10a   :  { %188 = vst.msk [vmem:[#allocation2] sm:$0xff] %vm187_vm11, %v186_v43  ;;  %293 = vst.msk [vmem:[#allocation3] sm:$0xff] %vm187_vm11, %v292_v44 }
 0x111   :  { %v298_v48 = vld [vmem:[#allocation3] sm:$0xff]  ;;  %v295_v9 = vld [vmem:[#allocation2] sm:$0xff] }
 0x112   :  { %623 = vmatmul.mubr.msk.f32.vlgmr.msra.gmra.mrb[0].mxu1 %vm187_vm11, %v298_v48 }
 0x113   :  { %672 = vmatpush3.bf16.msra.mxu1 %v671_v47  ;;  %629 = vmatprep.mubr.msk.f32.mxu1 %vm827_vm0, %v828_v6  ;;  %v470_v6 = vld [vmem:[#allocation10 + $0x30] sm:$0xff] }
 0x114   :  { %v683_v59 = vpack.c.bf16 %v471_v58, %v470_v6 }
 0x116   :  { %630 = vmatmul.mubr.msk.f32.vlgmr.msra.gmra.mrb[2].mxu1 %vm187_vm11, %v295_v9  ;;  %684 = vmatpush3.bf16.msra.mxu0 %v683_v59 }
 0x117   :  { %685 = vmatprep.subr.bf16.mxu0 %v826_v4 }
 0x11a   :  { %687 = vmatpush3.bf16.msra.mxu0 %v686_v62 }
 0x11b   :  { %688 = vmatprep.subr.bf16.mxu0 %v826_v4 }
 0x11e   :  { %690 = vmatpush3.bf16.msra.mxu0 %v689_v2 }
 0x11f   :  { %691 = vmatprep.subr.bf16.mxu0 %v826_v4 }
 0x122   :  { %693 = vmatpush3.bf16.msra.mxu0 %v692_v5 }
 0x123   :  { %694 = vmatprep.subr.bf16.mxu0 %v826_v4  ;;  %v594_v4 = vld [vmem:[%s992_s6] ss:$0 sm:$0xff] }
 0x126   :  { %696 = vmatpush3.bf16.msra.mxu0 %v695_v10 }
 0x1e5   :  { %v371_v11 = vpop.f32.mrb[0].mxu1 }
 0x1e6   :  { %v624_v12 = vpop.f32.mrb[1].mxu1 }
 0x1e9   :  { %v444_v13 = vpop.f32.mrb[2].mxu1 }
 0x1ea   :  { %v445_v16 = vadd.f32 %v444_v13, %v371_v11  ;;  %v631_v17 = vpop.f32.mrb[3].mxu1 }
 0x1ec   :  { %v455_v18 = vadd.f32 %v592_v15, %v445_v16 }
 0x1ee   :  { %v593_v19 = vmul.f32 -1.442695, %v455_v18 }
 0x1f0   :  { %722 = vpow2.f32 %v593_v19 }
 0x1fa   :  { %v723_v20 = vpop.eup %722 }
 0x1fb   :  { %v459_v21 = vadd.f32 1.0, %v723_v20 }
 0x1fd   :  { %724 = vrcp.f32 %v459_v21 }
 0x207   :  { %v725_v22 = vpop.eup %724 }
 0x208   :  { %v462_v23 = vmul.f32 %v725_v22, %v455_v18 }
 0x20a   :  { %665 = vmatmul.mubr.f32.vlgmr.msra.gmra.mrb[0].mxu0 %v462_v23 }
 0x2dd   :  { %v546_v24 = vpop.f32.mrb[0].mxu0 }
 0x2de   :  { %v563_v25 = vadd.f32 %v594_v4, %v546_v24  ;;  %v666_v26 = vpop.f32.mrb[1].mxu0 }
 0x2e0   :  { %564 = vst [vmem:[#allocation11] sm:$0xff] %v563_v25 }
 0x2e1   :  { %803 = shalt.err (!%p800_p0)
}
 0x2e2   :  { %s804_s3 = scalar_lea.hbm %s993_s7, 128 }
 0x2e3   :  { %p805_p1 = scmp.ne.s32.totalorder %s993_s7, %s804_s3  ;;  %p808_p2 = scmp.lt.u32.totalorder %s804_s3, %s993_s7 }
 0x2e5   :  { %p810_p3 = pnand %p808_p2, %p805_p1 }
 0x2e7   :  { %813 = shalt.err (!%p810_p3)
}
 0x2e8   :  { %574 = dma.vmem_to_hbm [thread:$0]  %s572_s23, 128, %s993_s7, [#allocation7]  }
 0x2e9   :  { %818 = dma.done.wait [#allocation7], 128  }
 0x2ea   :  { %819 = vsyncadd [#allocation7], 4294967168 }
 0x2eb   :  { %578 = vsyncpa [#allocation6], 1 }
 0x2ec   :  { %579 = vsyncpa [#allocation9], 1 }
 0x2ed   :  { %580 = vsyncpa [#allocation7], 1 }

</bundles_post_ra>
